<compile_context>
chip_gen: v7x
topology: tpu7x:2x2x1
jax: 0.10.0
libtpu: 0.0.40
codegen_flags: <defaults>
</compile_context>

<pallas_src>
import jax
import jax.numpy as jnp
from jax import lax
from jax.experimental import pallas as pl
from jax.experimental.pallas import tpu as pltpu

N_PAD = 128  # lane-dense padded class dimension


# -----------------------------------------------------------------------------
# Single fused kernel: conv(3x3,s2) as matmul + folded-BN shift + ReLU
#                      + (pool+flatten+linear) as one folded matmul.
# -----------------------------------------------------------------------------
def exit_block_fused_kernel(patches_ref, w_ref, shift_ref, a_ref, bias_ref, out_ref):
    # patches_ref: (N, K, Ho*Wo)      bf16   (im2col, transposed: K-major rows)
    # w_ref:       (Cout, K)          bf16   (BN scale folded in)
    # shift_ref:   (Cout, 1)          f32    (BN shift)
    # a_ref:       (Ho*Wo, Cout*128)  f32    (avg-pool + NCHW-flatten + classifier fold)
    # bias_ref:    (1, 128)           f32    (classifier bias, zero padded)
    # out_ref:     (N, 128)           f32    (padded logits, lane dense)
    n_batch = patches_ref.shape[0]
    cout = w_ref.shape[0]
    n_pad = out_ref.shape[1]

    w = w_ref[...]
    shift = shift_ref[...]
    a = a_ref[...]
    bias = bias_ref[...]

    for n in range(n_batch):  # static unroll over the (small) batch
        # conv as matmul on the MXU, f32 accumulation
        yt = jnp.dot(w, patches_ref[n], preferred_element_type=jnp.float32)  # (Cout, Ho*Wo)
        yt = jnp.maximum(yt + shift, 0.0)                                    # BN shift + ReLU
        # pool + flatten + linear folded into `a`:
        #   t[c, c*n_pad + k] = sum_r yt[c, r] * a[r, c*n_pad + k]
        t = jnp.dot(yt, a, preferred_element_type=jnp.float32)               # (Cout, Cout*n_pad)
        acc = bias                                                           # (1, n_pad)
        for c in range(cout):
            acc = acc + t[c:c + 1, c * n_pad:(c + 1) * n_pad]
        out_ref[pl.ds(n, 1), :] = acc


def exit_block_forward(x_nchw, params):
    """Pallas implementation of ExitBlock.forward (exit_type='conv')."""
    (w_oihw, gamma, beta, run_mean, run_var, wc, bc) = params
    eps = 1e-5

    N, Cin, H, W = x_nchw.shape
    Cout = w_oihw.shape[0]
    Ho = (H + 2 * 1 - 3) // 2 + 1                     # stride-2 conv, pad 1
    Wo = (W + 2 * 1 - 3) // 2 + 1
    Hp, Wp = Ho // 2, Wo // 2                         # AvgPool2d(2)
    K = 9 * Cin
    n_classes = wc.shape[0]
    n_pad = N_PAD
    assert Ho % 2 == 0 and Wo % 2 == 0, "pool fold assumes even conv output dims"
    assert n_classes <= n_pad

    # ---- glue: NCHW -> NHWC, pad, im2col patches (transposed: (N, K, Ho*Wo)) ----
    x_nhwc = jnp.transpose(x_nchw, (0, 2, 3, 1))
    xpad = jnp.pad(x_nhwc, ((0, 0), (1, 1), (1, 1), (0, 0)))
    cols = []
    for kh in range(3):
        for kw in range(3):
            cols.append(xpad[:, kh:kh + 2 * Ho - 1:2, kw:kw + 2 * Wo - 1:2, :])
    patches = jnp.concatenate(cols, axis=-1).reshape(N, Ho * Wo, K)
    patches_t = jnp.transpose(patches, (0, 2, 1)).astype(jnp.bfloat16)   # (N, K, Ho*Wo)

    # ---- fold BatchNorm (eval) scale into the conv weight; keep shift ----------
    scale = gamma / jnp.sqrt(run_var + eps)                       # (Cout,)
    shift = beta - run_mean * scale                               # (Cout,)
    w_mat = jnp.transpose(w_oihw, (2, 3, 1, 0)).reshape(K, Cout)  # (K, Cout)
    w_t = (w_mat * scale[None, :]).T.astype(jnp.bfloat16)         # (Cout, K)
    shift_t = shift.reshape(Cout, 1).astype(jnp.float32)

    # ---- fold AvgPool2d(2) + NCHW flatten + classifier into one matrix ---------
    # a3[r, c, k] = 0.25 * wc[k, c*Hp*Wp + (oh//2)*Wp + (ow//2)],  r = oh*Wo + ow
    r = jnp.arange(Ho * Wo)
    p_idx = (r // Wo // 2) * Wp + (r % Wo) // 2                            # (Ho*Wo,)
    flat_idx = jnp.arange(Cout)[None, :] * (Hp * Wp) + p_idx[:, None]      # (Ho*Wo, Cout)
    a3 = 0.25 * jnp.transpose(wc[:, flat_idx], (1, 2, 0))                  # (Ho*Wo, Cout, n_classes)
    a3 = jnp.pad(a3, ((0, 0), (0, 0), (0, n_pad - n_classes)))             # pad classes -> 128 lanes
    a2 = a3.reshape(Ho * Wo, Cout * n_pad).astype(jnp.float32)             # (Ho*Wo, Cout*128)

    bias_pad = jnp.pad(bc, (0, n_pad - n_classes)).reshape(1, n_pad).astype(jnp.float32)

    # ---- single fused pallas_call ----------------------------------------------
    out_pad = pl.pallas_call(
        exit_block_fused_kernel,
        out_shape=jax.ShapeDtypeStruct((N, n_pad), jnp.float32),
        grid_spec=pltpu.PrefetchScalarGridSpec(
            num_scalar_prefetch=0,
            grid=(1,),
            in_specs=[
                pl.BlockSpec((N, K, Ho * Wo), lambda i: (0, 0, 0)),
                pl.BlockSpec((Cout, K), lambda i: (0, 0)),
                pl.BlockSpec((Cout, 1), lambda i: (0, 0)),
                pl.BlockSpec((Ho * Wo, Cout * n_pad), lambda i: (0, 0)),
                pl.BlockSpec((1, n_pad), lambda i: (0, 0)),
            ],
            out_specs=pl.BlockSpec((N, n_pad), lambda i: (0, 0)),
        ),
    )(patches_t, w_t, shift_t, a2, bias_pad)

    return out_pad[:, :n_classes]


# -----------------------------------------------------------------------------
# Pure-JAX reference (mirrors the PyTorch forward, eval-mode BN) for validation.
# -----------------------------------------------------------------------------
def exit_block_reference(x_nchw, params):
    (w_oihw, gamma, beta, run_mean, run_var, wc, bc) = params
    eps = 1e-5
    y = lax.conv_general_dilated(
        x_nchw, w_oihw, window_strides=(2, 2), padding=((1, 1), (1, 1)),
        dimension_numbers=('NCHW', 'OIHW', 'NCHW'))
    y = (gamma[None, :, None, None] * (y - run_mean[None, :, None, None])
         / jnp.sqrt(run_var + eps)[None, :, None, None]
         + beta[None, :, None, None])
    y = jnp.maximum(y, 0.0)
    N, C, H, W = y.shape
    y = y.reshape(N, C, H // 2, 2, W // 2, 2).mean(axis=(3, 5))
    y = y.reshape(N, -1)
    return y @ wc.T + bc


if __name__ == "__main__":
    # Small shapes consistent with the module: input_shape = (N, 4, 16, 16)
    N, C, H, W = 2, 4, 16, 16
    n_classes = 10

    key = jax.random.PRNGKey(0)
    kx, kw, kg, kb, km, kv, kwc, kbc = jax.random.split(key, 8)

    x = jax.random.normal(kx, (N, C, H, W), jnp.float32)

    # Deterministic parameter init (shapes from ExitBlock.__init__, exit_type='conv')
    conv_w = 0.1 * jax.random.normal(kw, (C, C, 3, 3), jnp.float32)        # Conv2d weight
    bn_gamma = 0.5 + jax.random.uniform(kg, (C,), jnp.float32)             # BatchNorm2d weight
    bn_beta = 0.1 * jax.random.normal(kb, (C,), jnp.float32)               # BatchNorm2d bias
    bn_mean = 0.1 * jax.random.normal(km, (C,), jnp.float32)               # running_mean
    bn_var = 0.5 + jax.random.uniform(kv, (C,), jnp.float32)               # running_var
    total_neurons = C * (H // 4) * (W // 4)                                 # 4*4*4 = 64
    cls_w = 0.1 * jax.random.normal(kwc, (n_classes, total_neurons), jnp.float32)
    cls_b = 0.1 * jax.random.normal(kbc, (n_classes,), jnp.float32)

    params = (conv_w, bn_gamma, bn_beta, bn_mean, bn_var, cls_w, cls_b)

    out = exit_block_forward(x, params)
    out = jax.block_until_ready(out)

    ref = exit_block_reference(x, params)
    assert out.shape == (N, n_classes)
    assert jnp.allclose(out, ref, atol=3e-2, rtol=3e-2), \
        f"max abs err {jnp.max(jnp.abs(out - ref))}"

    print("KERNEL_OK")
</pallas_src>

<mosaic_0001>
module attributes {stable_mosaic.version = 11 : i64} {
  func.func @exit_block_fused_kernel(%arg0: i32, %arg1: memref<2x36x64xbf16, #tpu.memory_space<vmem>>, %arg2: memref<4x36xbf16, #tpu.memory_space<vmem>>, %arg3: memref<4x1xf32, #tpu.memory_space<vmem>>, %arg4: memref<64x512xf32, #tpu.memory_space<vmem>>, %arg5: memref<1x128xf32, #tpu.memory_space<vmem>>, %arg6: memref<2x128xf32, #tpu.memory_space<vmem>>) attributes {dimension_semantics = [#tpu.dimension_semantics<arbitrary>], iteration_bounds = array<i64: 1>, scalar_prefetch = 0 : i64, scratch_operands = 0 : i64, tpu.core_type = #tpu.core_type<tc>, window_params = [{pipeline_mode = #tpu.pipeline_mode<synchronous>, transform_indices = @transform_0, window_bounds = array<i64: 2, 36, 64>}, {pipeline_mode = #tpu.pipeline_mode<synchronous>, transform_indices = @transform_1, window_bounds = array<i64: 4, 36>}, {pipeline_mode = #tpu.pipeline_mode<synchronous>, transform_indices = @transform_2, window_bounds = array<i64: 4, 1>}, {pipeline_mode = #tpu.pipeline_mode<synchronous>, transform_indices = @transform_3, window_bounds = array<i64: 64, 512>}, {pipeline_mode = #tpu.pipeline_mode<synchronous>, transform_indices = @transform_4, window_bounds = array<i64: 1, 128>}, {pipeline_mode = #tpu.pipeline_mode<synchronous>, transform_indices = @transform_5, window_bounds = array<i64: 2, 128>}]} {
    %c0 = arith.constant 0 : index
    %c0_0 = arith.constant 0 : index
    %0 = vector.load %arg2[%c0, %c0_0] : memref<4x36xbf16, #tpu.memory_space<vmem>>, vector<4x36xbf16>
    %c0_1 = arith.constant 0 : index
    %c0_2 = arith.constant 0 : index
    %1 = vector.load %arg3[%c0_1, %c0_2] : memref<4x1xf32, #tpu.memory_space<vmem>>, vector<4x1xf32>
    %c0_3 = arith.constant 0 : index
    %c0_4 = arith.constant 0 : index
    %2 = vector.load %arg4[%c0_3, %c0_4] : memref<64x512xf32, #tpu.memory_space<vmem>>, vector<64x512xf32>
    %c0_5 = arith.constant 0 : index
    %c0_6 = arith.constant 0 : index
    %3 = vector.load %arg5[%c0_5, %c0_6] : memref<1x128xf32, #tpu.memory_space<vmem>>, vector<1x128xf32>
    %c0_7 = arith.constant 0 : index
    %c0_8 = arith.constant 0 : index
    %c0_9 = arith.constant 0 : index
    %4 = vector.load %arg1[%c0_7, %c0_8, %c0_9] : memref<2x36x64xbf16, #tpu.memory_space<vmem>>, vector<1x36x64xbf16>
    %5 = vector.shape_cast %4 : vector<1x36x64xbf16> to vector<36x64xbf16>
    %cst = arith.constant dense<0.000000e+00> : vector<4x64xf32>
    %6 = tpu.matmul %0, %5, %cst {dimension_numbers = #tpu.dot_dimension_numbers<[1], [0], [0], [1], [0, 0, 1, 1], [], []>} : vector<4x36xbf16>, vector<36x64xbf16>, vector<4x64xf32> -> vector<4x64xf32>
    %7 = vector.broadcast %1 : vector<4x1xf32> to vector<4x64xf32>
    %8 = arith.addf %6, %7 : vector<4x64xf32>
    %cst_10 = arith.constant 0.000000e+00 : f32
    %9 = vector.broadcast %cst_10 : f32 to vector<4x64xf32>
    %10 = arith.maximumf %8, %9 : vector<4x64xf32>
    %cst_11 = arith.constant dense<0.000000e+00> : vector<4x512xf32>
    %11 = tpu.matmul %10, %2, %cst_11 {dimension_numbers = #tpu.dot_dimension_numbers<[1], [0], [0], [1], [0, 0, 1, 1], [], []>} : vector<4x64xf32>, vector<64x512xf32>, vector<4x512xf32> -> vector<4x512xf32>
    %12 = vector.extract_strided_slice %11 {offsets = [0, 0], sizes = [1, 128], strides = [1, 1]} : vector<4x512xf32> to vector<1x128xf32>
    %13 = arith.addf %3, %12 : vector<1x128xf32>
    %14 = vector.extract_strided_slice %11 {offsets = [1, 128], sizes = [1, 128], strides = [1, 1]} : vector<4x512xf32> to vector<1x128xf32>
    %15 = arith.addf %13, %14 : vector<1x128xf32>
    %16 = vector.extract_strided_slice %11 {offsets = [2, 256], sizes = [1, 128], strides = [1, 1]} : vector<4x512xf32> to vector<1x128xf32>
    %17 = arith.addf %15, %16 : vector<1x128xf32>
    %18 = vector.extract_strided_slice %11 {offsets = [3, 384], sizes = [1, 128], strides = [1, 1]} : vector<4x512xf32> to vector<1x128xf32>
    %19 = arith.addf %17, %18 : vector<1x128xf32>
    %c0_12 = arith.constant 0 : index
    %c0_13 = arith.constant 0 : index
    %20 = vector.load %arg6[%c0_12, %c0_13] : memref<2x128xf32, #tpu.memory_space<vmem>>, vector<1x128xf32>
    tpu.vector_store %arg6[%c0_12, %c0_13], %19 {strides = array<i32>} : memref<2x128xf32, #tpu.memory_space<vmem>>, vector<1x128xf32>,
    %c1 = arith.constant 1 : index
    %c0_14 = arith.constant 0 : index
    %c0_15 = arith.constant 0 : index
    %21 = vector.load %arg1[%c1, %c0_14, %c0_15] : memref<2x36x64xbf16, #tpu.memory_space<vmem>>, vector<1x36x64xbf16>
    %22 = vector.shape_cast %21 : vector<1x36x64xbf16> to vector<36x64xbf16>
    %cst_16 = arith.constant dense<0.000000e+00> : vector<4x64xf32>
    %23 = tpu.matmul %0, %22, %cst_16 {dimension_numbers = #tpu.dot_dimension_numbers<[1], [0], [0], [1], [0, 0, 1, 1], [], []>} : vector<4x36xbf16>, vector<36x64xbf16>, vector<4x64xf32> -> vector<4x64xf32>
    %24 = vector.broadcast %1 : vector<4x1xf32> to vector<4x64xf32>
    %25 = arith.addf %23, %24 : vector<4x64xf32>
    %cst_17 = arith.constant 0.000000e+00 : f32
    %26 = vector.broadcast %cst_17 : f32 to vector<4x64xf32>
    %27 = arith.maximumf %25, %26 : vector<4x64xf32>
    %cst_18 = arith.constant dense<0.000000e+00> : vector<4x512xf32>
    %28 = tpu.matmul %27, %2, %cst_18 {dimension_numbers = #tpu.dot_dimension_numbers<[1], [0], [0], [1], [0, 0, 1, 1], [], []>} : vector<4x64xf32>, vector<64x512xf32>, vector<4x512xf32> -> vector<4x512xf32>
    %29 = vector.extract_strided_slice %28 {offsets = [0, 0], sizes = [1, 128], strides = [1, 1]} : vector<4x512xf32> to vector<1x128xf32>
    %30 = arith.addf %3, %29 : vector<1x128xf32>
    %31 = vector.extract_strided_slice %28 {offsets = [1, 128], sizes = [1, 128], strides = [1, 1]} : vector<4x512xf32> to vector<1x128xf32>
    %32 = arith.addf %30, %31 : vector<1x128xf32>
    %33 = vector.extract_strided_slice %28 {offsets = [2, 256], sizes = [1, 128], strides = [1, 1]} : vector<4x512xf32> to vector<1x128xf32>
    %34 = arith.addf %32, %33 : vector<1x128xf32>
    %35 = vector.extract_strided_slice %28 {offsets = [3, 384], sizes = [1, 128], strides = [1, 1]} : vector<4x512xf32> to vector<1x128xf32>
    %36 = arith.addf %34, %35 : vector<1x128xf32>
    %c1_19 = arith.constant 1 : index
    %c0_20 = arith.constant 0 : index
    %37 = vector.load %arg6[%c1_19, %c0_20] : memref<2x128xf32, #tpu.memory_space<vmem>>, vector<1x128xf32>
    tpu.vector_store %arg6[%c1_19, %c0_20], %36 {strides = array<i32>} : memref<2x128xf32, #tpu.memory_space<vmem>>, vector<1x128xf32>,
    return
  }
  func.func @transform_0(%arg0: i32) -> (i32, i32, i32) {
    %c0_i32 = arith.constant 0 : i32
    %c0_i32_0 = arith.constant 0 : i32
    %c0_i32_1 = arith.constant 0 : i32
    %c0_i32_2 = arith.constant 0 : i32
    return %c0_i32, %c0_i32_0, %c0_i32_1 : i32, i32, i32
  }
  func.func @transform_1(%arg0: i32) -> (i32, i32) {
    %c0_i32 = arith.constant 0 : i32
    %c0_i32_0 = arith.constant 0 : i32
    %c0_i32_1 = arith.constant 0 : i32
    return %c0_i32, %c0_i32_0 : i32, i32
  }
  func.func @transform_2(%arg0: i32) -> (i32, i32) {
    %c0_i32 = arith.constant 0 : i32
    %c0_i32_0 = arith.constant 0 : i32
    %c0_i32_1 = arith.constant 0 : i32
    return %c0_i32, %c0_i32_0 : i32, i32
  }
  func.func @transform_3(%arg0: i32) -> (i32, i32) {
    %c0_i32 = arith.constant 0 : i32
    %c0_i32_0 = arith.constant 0 : i32
    %c0_i32_1 = arith.constant 0 : i32
    return %c0_i32, %c0_i32_0 : i32, i32
  }
  func.func @transform_4(%arg0: i32) -> (i32, i32) {
    %c0_i32 = arith.constant 0 : i32
    %c0_i32_0 = arith.constant 0 : i32
    %c0_i32_1 = arith.constant 0 : i32
    return %c0_i32, %c0_i32_0 : i32, i32
  }
  func.func @transform_5(%arg0: i32) -> (i32, i32) {
    %c0_i32 = arith.constant 0 : i32
    %c0_i32_0 = arith.constant 0 : i32
    %c0_i32_1 = arith.constant 0 : i32
    return %c0_i32, %c0_i32_0 : i32, i32
  }
}

</mosaic_0001>

<bundles_post_ra>
// kernel: tpu_custom_call.1
= control target key start
LH: loop header
LB: loop body
LE: loop exit
PB: predicated region body
PF: predicated region fallthrough
CT: control target
= control target key end

     0   :  { %10 = vsyncpa [#allocation3], 0  ;;  %s949_s0 = inlined_call_operand.vmem [shape: bf16[2,36,64], index: 0, kind: input, shape index: {}]   ;;  %s950_s1 = inlined_call_operand.vmem [shape: bf16[4,36], index: 1, kind: input, shape index: {}]   ;;  %s951_s2 = inlined_call_operand.vmem [shape: f32[4,1], index: 2, kind: input, shape index: {}]   ;;  %s952_s3 = inlined_call_operand.hbm [shape: f32[64,512], index: 3, kind: input, shape index: {}]   ;;  %s953_s4 = inlined_call_operand.vmem [shape: f32[1,128], index: 4, kind: input, shape index: {}]   ;;  %s954_s5 = inlined_call_operand.hbm [shape: f32[2,128], index: 5, kind: output, shape index: {}]  }
   0x1   :  { %11 = vsyncpa [#allocation4], 0  ;;  %s802_s18 = smov [#allocation2]   ;;  %s754_s22 = scalar_lea.hbm %s952_s3, 4096 }
   0x2   :  { %s23_s19 = sshll.u32 %s802_s18, 4  ;;  %p755_p0 = scmp.ne.s32.totalorder %s952_s3, %s754_s22  ;;  %s24_s19 = int_to_ptr.vmem [resolvable:$true] %s23_s19 }
   0x3   :  { %p758_p1 = scmp.lt.u32.totalorder %s754_s22, %s952_s3 }
   0x5   :  { %p760_p2 = pnand %p758_p1, %p755_p0 }
   0x7   :  { %763 = shalt.err (!%p760_p2)
}
   0x8   :  { %s764_s27 = scalar_lea.vmem %s24_s19, 4096  ;;  %p769_p4 = scmp.lt.s32.totalorder %s24_s19, %s24_s19 }
   0x9   :  { %p765_p3 = scmp.ne.s32.totalorder %s24_s19, %s764_s27  ;;  %p770_p5 = scmp.lt.s32.totalorder %s764_s27, %s764_s27 }
   0xb   :  { %p771_p6 = por %p770_p5, %p769_p4 }
   0xd   :  { %p772_p7 = pnand %p771_p6, %p765_p3 }
   0xf   :  { %775 = shalt.err (!%p772_p7)
}
  0x10   :  { %s803_s28 = smov 512   ;;  %s804_s29 = smov 32  }
  0x11   :  { %29 = dma.hbm_to_vmem [thread:$0]  %s952_s3, 4096, %s24_s19, [#allocation3], %s803_s28, %s803_s28, %s804_s29  }
  0x12   :  { %798 = dma.done.wait [#allocation3], 4096  }
  0x13   :  { %799 = vsyncadd [#allocation3], 4294963200  ;;  %v805_v0 = vmov 0.0   ;;  %vm806_vm0 = vmmov 0   ;;  %v807_v1 = vmov 0   ;;  %v748_v2 = vld [vmem:[%s949_s0] sm:$0xff]  }
  0x14   :  { %655 = vmatprep.subr.bf16.mxu0 %v805_v0  ;;  %661 = vmatprep.mubr.msk.bf16.mxu0 %vm806_vm0, %v805_v0  ;;  %v749_v3 = vld [vmem:[%s949_s0 + $0x8] sm:$0xff]   ;;  %v750_v5 = vld [vmem:[%s949_s0 + $0x10] ss:$0 sps:$4 sm:$0x33]   ;;  %v37_v6 = vld [vmem:[%s951_s2] sm:$0xf] }
  0x15   :  { %747 = vset.pattern.permute.xlu0 %v807_v1  ;;  %213 = vmatprep.mubr.f32.mxu1 %v805_v0  ;;  %v39_v4 = vld [vmem:[#allocation2 + $0x8] sm:$0xff]  ;;  %vm100_vm1 = vcmask 1041408   ;;  %v38_v9 = vld [vmem:[#allocation2] sm:$0xff]  ;;  %v41_v11 = vld [vmem:[#allocation2 + $0x18] sm:$0xff]  ;;  %vm96_vm2 = vcmask 293888   ;;  %vm145_vm3 = vcmask 523264  }
  0x16   :  { %656 = vmatpush3.bf16.msra.mxu0 %v748_v2  ;;  %v43_v7 = vld [vmem:[#allocation2 + $0x28] sm:$0xff]  ;;  %78 = vperm.xlu0 %747, %v37_v6   ;;  %v42_v10 = vld [vmem:[#allocation2 + $0x20] sm:$0xff]  ;;  %v45_v13 = vld [vmem:[#allocation2 + $0x38] sm:$0xff]  ;;  %v102_v17 = vsel %vm100_vm1, %v750_v5, 0  ;;  %v296_v6 = vlaneseq }
  0x17   :  { %657 = vmatprep.subr.bf16.mxu0 %v805_v0  ;;  %v869_v8 = vpack.c.bf16 %v43_v7, %v39_v4  ;;  %v871_v12 = vpack.c.bf16 %v42_v10, %v38_v9  ;;  %v47_v14 = vld [vmem:[#allocation2 + $0x48] sm:$0xff]  ;;  %v46_v16 = vld [vmem:[#allocation2 + $0x40] sm:$0xff]  ;;  %v877_v18 = vpack.c.bf16 %v45_v13, %v41_v11  ;;  %v40_v19 = vld [vmem:[#allocation2 + $0x10] sm:$0xff]  ;;  %v808_v4 = vmov 1966171168  }
  0x18   :  { %v51_v15 = vld [vmem:[#allocation2 + $0x68] sm:$0xff]  ;;  %v44_v20 = vld [vmem:[#allocation2 + $0x30] sm:$0xff]  ;;  %v50_v22 = vld [vmem:[#allocation2 + $0x60] sm:$0xff]  ;;  %v294_v5 = vunpack.c.l.s4 %v808_v4 }
  0x19   :  { %676 = vmatprep.subr.bf16.mxu1 %v869_v8  ;;  %v879_v21 = vpack.c.bf16 %v51_v15, %v47_v14  ;;  %v884_v23 = vld [vmem:[%s950_s1] sm:$0x3]  ;;  %v886_v24 = vpack.c.bf16 %v50_v22, %v46_v16  ;;  %v49_v25 = vld [vmem:[#allocation2 + $0x58] sm:$0xff]  ;;  %v55_v27 = vld [vmem:[#allocation2 + $0x88] sm:$0xff]  ;;  %v889_v31 = vpack.c.bf16 %v44_v20, %v40_v19 }
  0x1a   :  { %658 = vmatpush3.bf16.msra.mxu0 %v749_v3  ;;  %678 = vmatpush1.bf16.msra.mxu1 %v871_v12  ;;  %v53_v26 = vld [vmem:[#allocation2 + $0x78] sm:$0xff]  ;;  %v59_v28 = vld [vmem:[#allocation2 + $0xa8] sm:$0xff]  ;;  %v54_v29 = vld [vmem:[#allocation2 + $0x80] sm:$0xff]  ;;  %v295_v7 = vunpack.c.0.s8 %v294_v5 }
  0x1b   :  { %659 = vmatprep.subr.bf16.mxu0 %v805_v0  ;;  %680 = vmatprep.subr.bf16.mxu1 %v879_v21  ;;  %v58_v30 = vld [vmem:[#allocation2 + $0xa0] sm:$0xff]  ;;  %v48_v32 = vld [vmem:[#allocation2 + $0x50] sm:$0xff]  ;;  %v683_v34 = vpack.c.bf16 %v59_v28, %v55_v27  ;;  %v57_v35 = vld [vmem:[#allocation2 + $0x98] sm:$0xff]  ;;  %v893_v36 = vpack.c.bf16 %v53_v26, %v49_v25 }
  0x1c   :  { %v52_v33 = vld [vmem:[#allocation2 + $0x70] sm:$0xff]  ;;  %v685_v37 = vpack.c.bf16 %v58_v30, %v54_v29  ;;  %v61_v38 = vld [vmem:[#allocation2 + $0xb8] sm:$0xff]  ;;  %v63_v39 = vld [vmem:[#allocation2 + $0xc8] sm:$0xff] }
  0x1d   :  { %v67_v40 = vld [vmem:[#allocation2 + $0xe8] sm:$0xff]  ;;  %v697_v42 = vpack.c.bf16 %v52_v33, %v48_v32  ;;  %v699_v43 = vpack.c.bf16 %v61_v38, %v57_v35  ;;  %v56_v44 = vld [vmem:[#allocation2 + $0x90] sm:$0xff]  ;;  %v62_v47 = vld [vmem:[#allocation2 + $0xc0] sm:$0xff] }
  0x1e   :  { %660 = vmatpush3.bf16.msra.mxu0 %v102_v17  ;;  %682 = vmatpush1.bf16.msra.mxu1 %v886_v24  ;;  %v687_v41 = vpack.c.bf16 %v67_v40, %v63_v39  ;;  %v60_v45 = vld [vmem:[#allocation2 + $0xb0] sm:$0xff]  ;;  %v66_v48 = vld [vmem:[#allocation2 + $0xe0] sm:$0xff]  ;;  %v65_v49 = vld [vmem:[#allocation2 + $0xd8] sm:$0xff] }
  0x1f   :  { %692 = vmatprep.subr.bf16.mxu0 %v877_v18  ;;  %684 = vmatprep.subr.bf16.mxu1 %v683_v34  ;;  %v701_v46 = vpack.c.bf16 %v60_v45, %v56_v44  ;;  %v689_v50 = vpack.c.bf16 %v66_v48, %v62_v47  ;;  %v69_v51 = vld [vmem:[#allocation2 + $0xf8] sm:$0xff]  ;;  %v64_v52 = vld [vmem:[#allocation2 + $0xd0] sm:$0xff]  ;;  %v753_v2 = vld [vmem:[%s949_s0 + $0x24] ss:$0 sps:$4 sm:$0x33]  }
  0x20   :  { %v68_v53 = vld [vmem:[#allocation2 + $0xf0] sm:$0xff]  ;;  %v703_v54 = vpack.c.bf16 %v69_v51, %v65_v49  ;;  %v752_v1 = vld [vmem:[%s949_s0 + $0x1c] sm:$0xff]   ;;  %v370_v3 = vsel %vm100_vm1, %v753_v2, 0 }
  0x21   :  { %662 = vmatmul.mubr.msk.bf16.vlgmr.msra.gmra.mrb[0].mxu0 %vm96_vm2, %v884_v23  ;;  %v705_v55 = vpack.c.bf16 %v68_v53, %v64_v52  ;;  %v751_v61 = vld [vmem:[%s949_s0 + $0x14] sm:$0xff]   ;;  %v70_v16 = vld [vmem:[%s953_s4] sm:$0x1]  ;;  %s809_s4 = smov [#allocation5]  }
  0x22   :  { %694 = vmatpush1.bf16.msra.mxu0 %v889_v31  ;;  %284 = vmatprep.mubr.f32.mxu0 %v805_v0  ;;  %s621_s21 = sshll.u32 %s809_s4, 4  ;;  %s622_s21 = int_to_ptr.vmem [resolvable:$true] %s621_s21 }
  0x23   :  { %696 = vmatprep.subr.bf16.mxu0 %v893_v36  ;;  %686 = vmatpush1.bf16.msra.mxu1 %v685_v37  ;;  %s776_s22 = scalar_lea.vmem %s622_s21, 32  ;;  %p781_p9 = scmp.lt.s32.totalorder %s622_s21, %s622_s21 }
  0x24   :  { %688 = vmatprep.subr.bf16.mxu1 %v687_v41  ;;  %p777_p8 = scmp.ne.s32.totalorder %s622_s21, %s776_s22  ;;  %p782_p10 = scmp.lt.s32.totalorder %s776_s22, %s776_s22 }
  0x26   :  { %698 = vmatpush1.bf16.msra.mxu0 %v697_v42  ;;  %p783_p11 = por %p782_p10, %p781_p9 }
  0x27   :  { %700 = vmatprep.subr.bf16.mxu0 %v699_v43  ;;  %690 = vmatpush1.bf16.msra.mxu1 %v689_v50 }
  0x28   :  { %665 = vmatprep.subr.bf16.mxu1 %v805_v0  ;;  %p784_p12 = pnand %p783_p11, %p777_p8 }
  0x2a   :  { %702 = vmatpush1.bf16.msra.mxu0 %v701_v46 }
  0x2b   :  { %704 = vmatprep.subr.bf16.mxu0 %v703_v54 }
  0x2e   :  { %706 = vmatpush1.bf16.msra.mxu0 %v705_v55 }
  0x2f   :  { %708 = vmatprep.subr.bf16.mxu0 %v869_v8  ;;  %v297_v8 = vshrl.u32 %v296_v6, 7 }
  0x31   :  { %v298_v9 = vsub.s32 %v295_v7, %v297_v8 }
  0x95   :  { %v902_v56 = vpop.permute.xlu0 %78 }
  0xf4   :  { %v138_v57 = vpop.f32.mrb[0].mxu0 }
  0xf5   :  { %v139_v58 = vadd.f32 %v138_v57, %v902_v56  ;;  %v663_v59 = vpop.f32.mrb[1].mxu0 }
  0xf6   :  { %v141_v60 = vpop.f32.mrb[2].mxu0 }
  0xf7   :  { %v144_v62 = vmax.f32 %v139_v58, 0.0  ;;  %v664_v63 = vpop.f32.mrb[3].mxu0 }
  0xf9   :  { %634 = vmatmul.mubr.msk.f32.vlgmr.msra.gmra.mrb[0].mxu1 %vm145_vm3, %v144_v62  ;;  %635 = vmatmul.mubr.msk.f32.vlgmr.msra.gmra.mrb[4].mxu0 %vm145_vm3, %v144_v62 }
  0xfa   :  { %666 = vmatpush3.bf16.msra.mxu1 %v751_v61  ;;  %671 = vmatprep.mubr.msk.bf16.mxu1 %vm806_vm0, %v805_v0 }
  0xfb   :  { %667 = vmatprep.subr.bf16.mxu1 %v805_v0  ;;  %710 = vmatpush1.bf16.msra.mxu0 %v871_v12 }
  0xfc   :  { %712 = vmatprep.subr.bf16.mxu0 %v879_v21  ;;  %480 = vmatprep.mubr.f32.mxu0 %v805_v0 }
  0xfe   :  { %668 = vmatpush3.bf16.msra.mxu1 %v752_v1 }
  0xff   :  { %669 = vmatprep.subr.bf16.mxu1 %v805_v0  ;;  %714 = vmatpush1.bf16.msra.mxu0 %v886_v24 }
 0x100   :  { %716 = vmatprep.subr.bf16.mxu0 %v683_v34 }
 0x102   :  { %670 = vmatpush3.bf16.msra.mxu1 %v370_v3 }
 0x103   :  { %724 = vmatprep.subr.bf16.mxu1 %v877_v18  ;;  %718 = vmatpush1.bf16.msra.mxu0 %v685_v37 }
 0x104   :  { %720 = vmatprep.subr.bf16.mxu0 %v687_v41 }
 0x105   :  { %672 = vmatmul.mubr.msk.bf16.vlgmr.msra.gmra.mrb[4].mxu1 %vm96_vm2, %v884_v23 }
 0x106   :  { %726 = vmatpush1.bf16.msra.mxu1 %v889_v31  ;;  %551 = vmatprep.mubr.f32.mxu1 %v805_v0 }
 0x107   :  { %728 = vmatprep.subr.bf16.mxu1 %v893_v36  ;;  %722 = vmatpush1.bf16.msra.mxu0 %v689_v50 }
 0x10a   :  { %730 = vmatpush1.bf16.msra.mxu1 %v697_v42 }
 0x10b   :  { %732 = vmatprep.subr.bf16.mxu1 %v699_v43 }
 0x10e   :  { %734 = vmatpush1.bf16.msra.mxu1 %v701_v46 }
 0x10f   :  { %736 = vmatprep.subr.bf16.mxu1 %v703_v54 }
 0x112   :  { %738 = vmatpush1.bf16.msra.mxu1 %v705_v55 }
 0x1cc   :  { %v215_v10 = vpop.f32.mrb[0].mxu1  ;;  %v286_v11 = vpop.f32.mrb[4].mxu0 }
 0x1cd   :  { %v317_v12 = vrot.slane %v286_v11, %v298_v9  ;;  %v217_v13 = vpop.f32.mrb[1].mxu1  ;;  %v288_v14 = vpop.f32.mrb[5].mxu0  ;;  %v291_v20 = vadd.f32 %v215_v10, %v70_v16 }
 0x1ce   :  { %v299_v0 = vrot.slane %v217_v13, %v298_v9  ;;  %v335_v15 = vrot.slane %v288_v14, %v298_v9 }
 0x1cf   :  { %v324_v17 = vrot.slane %v317_v12, %v298_v9 }
 0x1d0   :  { %v300_v18 = vcombine.high %v299_v0, %v299_v0  ;;  %v336_v19 = vcombine.high %v335_v15, %v335_v15 }
 0x1d1   :  { %v325_v23 = vcombine.high %v324_v17, %v324_v17 }
 0x1d2   :  { %v307_v21 = vrot.slane %v300_v18, %v298_v9  ;;  %v343_v22 = vrot.slane %v336_v19, %v298_v9 }
 0x1d4   :  { %v309_v24 = vadd.f32 %v307_v21, %v291_v20  ;;  %v344_v26 = vcombine.high %v343_v22, %v343_v22 }
 0x1d6   :  { %v327_v25 = vadd.f32 %v325_v23, %v309_v24 }
 0x1d8   :  { %v406_v27 = vpop.f32.mrb[4].mxu1  ;;  %v346_v28 = vadd.f32 %v344_v26, %v327_v25 }
 0x1d9   :  { %v407_v29 = vadd.f32 %v406_v27, %v902_v56  ;;  %v673_v30 = vpop.f32.mrb[5].mxu1 }
 0x1da   :  { %v409_v31 = vpop.f32.mrb[6].mxu1  ;;  %347 = vst [vmem:[#allocation5] sm:$0x1] %v346_v28 }
 0x1db   :  { %v412_v32 = vmax.f32 %v407_v29, 0.0  ;;  %v674_v33 = vpop.f32.mrb[7].mxu1 }
 0x1dd   :  { %645 = vmatmul.mubr.msk.f32.vlgmr.msra.gmra.mrb[6].mxu0 %vm145_vm3, %v412_v32  ;;  %646 = vmatmul.mubr.msk.f32.vlgmr.msra.gmra.mrb[2].mxu1 %vm145_vm3, %v412_v32 }
 0x2b0   :  { %v482_v34 = vpop.f32.mrb[6].mxu0  ;;  %v553_v35 = vpop.f32.mrb[2].mxu1 }
 0x2b1   :  { %v584_v36 = vrot.slane %v553_v35, %v298_v9  ;;  %v484_v37 = vpop.f32.mrb[7].mxu0  ;;  %v555_v38 = vpop.f32.mrb[3].mxu1  ;;  %v558_v44 = vadd.f32 %v482_v34, %v70_v16 }
 0x2b2   :  { %v566_v39 = vrot.slane %v484_v37, %v298_v9  ;;  %v602_v40 = vrot.slane %v555_v38, %v298_v9 }
 0x2b3   :  { %v591_v41 = vrot.slane %v584_v36, %v298_v9 }
 0x2b4   :  { %v567_v42 = vcombine.high %v566_v39, %v566_v39  ;;  %v603_v43 = vcombine.high %v602_v40, %v602_v40 }
 0x2b5   :  { %v592_v47 = vcombine.high %v591_v41, %v591_v41 }
 0x2b6   :  { %v574_v45 = vrot.slane %v567_v42, %v298_v9  ;;  %v610_v46 = vrot.slane %v603_v43, %v298_v9 }
 0x2b8   :  { %v576_v48 = vadd.f32 %v574_v45, %v558_v44  ;;  %v611_v50 = vcombine.high %v610_v46, %v610_v46 }
 0x2ba   :  { %v594_v49 = vadd.f32 %v592_v47, %v576_v48 }
 0x2bc   :  { %v613_v51 = vadd.f32 %v611_v50, %v594_v49 }
 0x2be   :  { %614 = vst [vmem:[#allocation5 + $0x1] sm:$0x1] %v613_v51 }
 0x2bf   :  { %787 = shalt.err (!%p784_p12)
}
 0x2c0   :  { %s788_s25 = scalar_lea.hbm %s954_s5, 32 }
 0x2c1   :  { %p789_p13 = scmp.ne.s32.totalorder %s954_s5, %s788_s25  ;;  %p792_p0 = scmp.lt.u32.totalorder %s788_s25, %s954_s5 }
 0x2c3   :  { %p794_p1 = pnand %p792_p0, %p789_p13 }
 0x2c5   :  { %797 = shalt.err (!%p794_p1)
}
 0x2c6   :  { %624 = dma.vmem_to_hbm [thread:$0]  %s622_s21, 32, %s954_s5, [#allocation4]  }
 0x2c7   :  { %800 = dma.done.wait [#allocation4], 32  }
 0x2c8   :  { %801 = vsyncadd [#allocation4], 4294967264 }
 0x2c9   :  { %628 = vsyncpa [#allocation3], 1 }
 0x2ca   :  { %629 = vsyncpa [#allocation4], 1 }

</bundles_post_ra>
